<compile_context>
chip_gen: v5e
topology: v5e:2x2
jax: 0.10.0
libtpu: 0.0.40
codegen_flags: <defaults>
</compile_context>

<pallas_src>
import jax
import jax.numpy as jnp
from jax.experimental import pallas as pl
from jax.experimental.pallas import tpu as pltpu


def _round_up(x, m):
    return ((x + m - 1) // m) * m


def _value_mlp_kernel(x_ref, w1t_ref, ws_ref, bs_ref, wo_ref, bo_ref, o_ref):
    """One batch tile of the 7-layer MLP, feature-major layout.

    x_ref  : (Din, TM) f32  -- batch on lanes
    w1t_ref: (H, Din) bf16  -- layer-1 weight, transposed
    ws_ref : (5, H, H) bf16 -- layers 2..6 weights, transposed, stacked
    bs_ref : (6, H, 1) f32  -- biases of layers 1..6
    wo_ref : (H, 1) f32     -- output layer weight
    bo_ref : (1, 1) f32     -- output layer bias
    o_ref  : (1, TM) f32
    """
    # Layer 1: (H, Din) @ (Din, TM) -> (H, TM), f32 accumulate on the MXU.
    h = jnp.dot(w1t_ref[...], x_ref[...].astype(jnp.bfloat16),
                preferred_element_type=jnp.float32)
    h = jnp.maximum(h + bs_ref[0], 0.0)

    # Layers 2..6 (static unroll over the stacked weights).
    for l in range(ws_ref.shape[0]):
        h = jnp.dot(ws_ref[l], h.astype(jnp.bfloat16),
                    preferred_element_type=jnp.float32)
        h = jnp.maximum(h + bs_ref[l + 1], 0.0)

    # Output layer: N=1 matmul done as VPU multiply + cross-sublane reduce
    # (frees the MXU result path; keeps the store lane-dense).
    out = jnp.sum(h * wo_ref[...], axis=0, keepdims=True) + bo_ref[...]
    o_ref[...] = out.astype(o_ref.dtype)


def pack_params(params):
    """One-time packing of PyTorch-style params into kernel operands."""
    H = params["w2"].shape[0]
    return {
        "w1t": params["w1"].T.astype(jnp.bfloat16),                     # (H, Din)
        "wst": jnp.stack([params[f"w{i}"].T for i in range(2, 7)]
                         ).astype(jnp.bfloat16),                        # (5, H, H)
        "bst": jnp.stack([params[f"b{i}"].reshape(H, 1)
                          for i in range(1, 7)]).astype(jnp.float32),   # (6, H, 1)
        "wo": params["wo"].reshape(H, 1).astype(jnp.float32),           # (H, 1)
        "bo": params["bo"].reshape(1, 1).astype(jnp.float32),           # (1, 1)
    }


def value_network_forward(x, packed, *, tm=None):
    """x: (batch, input_dim) f32 -> (batch, 1) f32."""
    batch, input_dim = x.shape
    H = packed["w1t"].shape[0]

    # Lane tile for the batch axis: multiple of 128, capped at 512 so the
    # (H, TM) f32 activations stay small (<=128 KiB) while amortizing the
    # per-grid-step overhead for large batches.
    TM = tm if tm is not None else min(512, _round_up(batch, 128))
    Bpad = _round_up(batch, TM)
    grid = (Bpad // TM,)

    # Transpose to feature-major and pad the batch (lane) axis (cheap XLA ops;
    # padded lanes produce values that are sliced off below).
    xt = jnp.pad(x.T.astype(jnp.float32), ((0, 0), (0, Bpad - batch)))

    w1t, wst, bst, wo, bo = (packed["w1t"], packed["wst"], packed["bst"],
                             packed["wo"], packed["bo"])

    nflops = 2 * Bpad * (input_dim * H + 5 * H * H + H)
    nbytes = (xt.size * 4 + w1t.size * 2 + wst.size * 2
              + bst.size * 4 + wo.size * 4 + bo.size * 4 + Bpad * 4)

    out = pl.pallas_call(
        _value_mlp_kernel,
        out_shape=jax.ShapeDtypeStruct((1, Bpad), jnp.float32),
        grid_spec=pltpu.PrefetchScalarGridSpec(
            num_scalar_prefetch=0,
            grid=grid,
            in_specs=[
                pl.BlockSpec((input_dim, TM), lambda i: (0, i)),   # x tile
                pl.BlockSpec((H, input_dim), lambda i: (0, 0)),    # w1t (resident)
                pl.BlockSpec((5, H, H), lambda i: (0, 0, 0)),      # wstack (resident)
                pl.BlockSpec((6, H, 1), lambda i: (0, 0, 0)),      # bstack (resident)
                pl.BlockSpec((H, 1), lambda i: (0, 0)),            # wo (resident)
                pl.BlockSpec((1, 1), lambda i: (0, 0)),            # bo (resident)
            ],
            out_specs=pl.BlockSpec((1, TM), lambda i: (0, i)),
        ),
        compiler_params=pltpu.CompilerParams(
            dimension_semantics=("parallel",)),
        cost_estimate=pl.CostEstimate(
            flops=nflops, transcendentals=0, bytes_accessed=nbytes),
    )(xt, w1t, wst, bst, wo, bo)

    # (1, Bpad) -> (batch, 1)
    return out[:, :batch].T


def init_params(key, input_dim, hidden_size=64):
    """Deterministic init mirroring nn.Linear's default U(-1/sqrt(fan_in), ...)."""
    dims = ([(input_dim, hidden_size)] + [(hidden_size, hidden_size)] * 5
            + [(hidden_size, 1)])
    names = [str(i) for i in range(1, 7)] + ["o"]
    keys = jax.random.split(key, 2 * len(dims))
    params = {}
    for n, (name, (fan_in, fan_out)) in enumerate(zip(names, dims)):
        bound = 1.0 / (fan_in ** 0.5)
        params[f"w{name}"] = jax.random.uniform(
            keys[2 * n], (fan_in, fan_out), jnp.float32, -bound, bound)
        params[f"b{name}"] = jax.random.uniform(
            keys[2 * n + 1], (fan_out,), jnp.float32, -bound, bound)
    return params


def reference_forward(x, params):
    """Pure f32 reference of the PyTorch forward."""
    h = x
    for i in range(1, 7):
        h = jnp.maximum(h @ params[f"w{i}"] + params[f"b{i}"], 0.0)
    return h @ params["wo"] + params["bo"]


def reference_forward_bf16(x, params):
    """Reference emulating the kernel's bf16-matmul / f32-accumulate numerics."""
    h = x.astype(jnp.float32)
    for i in range(1, 7):
        w = params[f"w{i}"].astype(jnp.bfloat16)
        h = jnp.dot(h.astype(jnp.bfloat16), w, preferred_element_type=jnp.float32)
        h = jnp.maximum(h + params[f"b{i}"], 0.0)
    return h @ params["wo"] + params["bo"]


if __name__ == "__main__":
    key = jax.random.PRNGKey(0)
    k_param, k_x = jax.random.split(key)

    input_dim = 8
    hidden_size = 64
    batch = 8

    params = init_params(k_param, input_dim, hidden_size)
    packed = pack_params(params)
    x = jax.random.normal(k_x, (batch, input_dim), jnp.float32)

    out = value_network_forward(x, packed)
    out = jax.block_until_ready(out)

    assert out.shape == (batch, 1), out.shape

    # Tight check against a reference that uses the same bf16 matmul numerics.
    ref_bf16 = reference_forward_bf16(x, params)
    assert jnp.allclose(out, ref_bf16, atol=1e-2, rtol=1e-2), (out, ref_bf16)

    # Loose sanity check against the pure-f32 PyTorch-equivalent forward
    # (bf16 weights => ~1e-2-level deviation expected).
    ref_f32 = reference_forward(x, params)
    assert jnp.allclose(out, ref_f32, atol=5e-2, rtol=5e-2), (out, ref_f32)

    print("KERNEL_OK")
</pallas_src>

<mosaic_0001>
module attributes {stable_mosaic.version = 11 : i64} {
  func.func @_value_mlp_kernel(%arg0: i32, %arg1: memref<8x128xf32, #tpu.memory_space<vmem>>, %arg2: memref<64x8xbf16, #tpu.memory_space<vmem>>, %arg3: memref<5x64x64xbf16, #tpu.memory_space<vmem>>, %arg4: memref<6x64x1xf32, #tpu.memory_space<vmem>>, %arg5: memref<64x1xf32, #tpu.memory_space<vmem>>, %arg6: memref<1x1xf32, #tpu.memory_space<vmem>>, %arg7: memref<1x128xf32, #tpu.memory_space<vmem>>) attributes {dimension_semantics = [#tpu.dimension_semantics<parallel>], iteration_bounds = array<i64: 1>, scalar_prefetch = 0 : i64, scratch_operands = 0 : i64, tpu.core_type = #tpu.core_type<tc>, window_params = [{transform_indices = @transform_0, window_bounds = array<i64: 8, 128>}, {pipeline_mode = #tpu.pipeline_mode<synchronous>, transform_indices = @transform_1, window_bounds = array<i64: 64, 8>}, {pipeline_mode = #tpu.pipeline_mode<synchronous>, transform_indices = @transform_2, window_bounds = array<i64: 5, 64, 64>}, {pipeline_mode = #tpu.pipeline_mode<synchronous>, transform_indices = @transform_3, window_bounds = array<i64: 6, 64, 1>}, {pipeline_mode = #tpu.pipeline_mode<synchronous>, transform_indices = @transform_4, window_bounds = array<i64: 64, 1>}, {pipeline_mode = #tpu.pipeline_mode<synchronous>, transform_indices = @transform_5, window_bounds = array<i64: 1, 1>}, {transform_indices = @transform_6, window_bounds = array<i64: 1, 128>}]} {
    %c0 = arith.constant 0 : index
    %c0_0 = arith.constant 0 : index
    %0 = vector.load %arg2[%c0, %c0_0] : memref<64x8xbf16, #tpu.memory_space<vmem>>, vector<64x8xbf16>
    %c0_1 = arith.constant 0 : index
    %c0_2 = arith.constant 0 : index
    %1 = vector.load %arg1[%c0_1, %c0_2] : memref<8x128xf32, #tpu.memory_space<vmem>>, vector<8x128xf32>
    %2 = arith.truncf %1 : vector<8x128xf32> to vector<8x128xbf16>
    %cst = arith.constant dense<0.000000e+00> : vector<64x128xf32>
    %3 = tpu.matmul %0, %2, %cst {dimension_numbers = #tpu.dot_dimension_numbers<[1], [0], [0], [1], [0, 0, 1, 1], [], []>} : vector<64x8xbf16>, vector<8x128xbf16>, vector<64x128xf32> -> vector<64x128xf32>
    %c0_3 = arith.constant 0 : index
    %c0_4 = arith.constant 0 : index
    %c0_5 = arith.constant 0 : index
    %4 = vector.load %arg4[%c0_3, %c0_4, %c0_5] : memref<6x64x1xf32, #tpu.memory_space<vmem>>, vector<1x64x1xf32>
    %5 = vector.shape_cast %4 : vector<1x64x1xf32> to vector<64x1xf32>
    %6 = vector.broadcast %5 : vector<64x1xf32> to vector<64x128xf32>
    %7 = arith.addf %3, %6 : vector<64x128xf32>
    %cst_6 = arith.constant 0.000000e+00 : f32
    %8 = vector.broadcast %cst_6 : f32 to vector<64x128xf32>
    %9 = arith.maximumf %7, %8 : vector<64x128xf32>
    %c0_7 = arith.constant 0 : index
    %c0_8 = arith.constant 0 : index
    %c0_9 = arith.constant 0 : index
    %10 = vector.load %arg3[%c0_7, %c0_8, %c0_9] : memref<5x64x64xbf16, #tpu.memory_space<vmem>>, vector<1x64x64xbf16>
    %11 = vector.shape_cast %10 : vector<1x64x64xbf16> to vector<64x64xbf16>
    %12 = arith.truncf %9 : vector<64x128xf32> to vector<64x128xbf16>
    %cst_10 = arith.constant dense<0.000000e+00> : vector<64x128xf32>
    %13 = tpu.matmul %11, %12, %cst_10 {dimension_numbers = #tpu.dot_dimension_numbers<[1], [0], [0], [1], [0, 0, 1, 1], [], []>} : vector<64x64xbf16>, vector<64x128xbf16>, vector<64x128xf32> -> vector<64x128xf32>
    %c1 = arith.constant 1 : index
    %c0_11 = arith.constant 0 : index
    %c0_12 = arith.constant 0 : index
    %14 = vector.load %arg4[%c1, %c0_11, %c0_12] : memref<6x64x1xf32, #tpu.memory_space<vmem>>, vector<1x64x1xf32>
    %15 = vector.shape_cast %14 : vector<1x64x1xf32> to vector<64x1xf32>
    %16 = vector.broadcast %15 : vector<64x1xf32> to vector<64x128xf32>
    %17 = arith.addf %13, %16 : vector<64x128xf32>
    %cst_13 = arith.constant 0.000000e+00 : f32
    %18 = vector.broadcast %cst_13 : f32 to vector<64x128xf32>
    %19 = arith.maximumf %17, %18 : vector<64x128xf32>
    %c1_14 = arith.constant 1 : index
    %c0_15 = arith.constant 0 : index
    %c0_16 = arith.constant 0 : index
    %20 = vector.load %arg3[%c1_14, %c0_15, %c0_16] : memref<5x64x64xbf16, #tpu.memory_space<vmem>>, vector<1x64x64xbf16>
    %21 = vector.shape_cast %20 : vector<1x64x64xbf16> to vector<64x64xbf16>
    %22 = arith.truncf %19 : vector<64x128xf32> to vector<64x128xbf16>
    %cst_17 = arith.constant dense<0.000000e+00> : vector<64x128xf32>
    %23 = tpu.matmul %21, %22, %cst_17 {dimension_numbers = #tpu.dot_dimension_numbers<[1], [0], [0], [1], [0, 0, 1, 1], [], []>} : vector<64x64xbf16>, vector<64x128xbf16>, vector<64x128xf32> -> vector<64x128xf32>
    %c2 = arith.constant 2 : index
    %c0_18 = arith.constant 0 : index
    %c0_19 = arith.constant 0 : index
    %24 = vector.load %arg4[%c2, %c0_18, %c0_19] : memref<6x64x1xf32, #tpu.memory_space<vmem>>, vector<1x64x1xf32>
    %25 = vector.shape_cast %24 : vector<1x64x1xf32> to vector<64x1xf32>
    %26 = vector.broadcast %25 : vector<64x1xf32> to vector<64x128xf32>
    %27 = arith.addf %23, %26 : vector<64x128xf32>
    %cst_20 = arith.constant 0.000000e+00 : f32
    %28 = vector.broadcast %cst_20 : f32 to vector<64x128xf32>
    %29 = arith.maximumf %27, %28 : vector<64x128xf32>
    %c2_21 = arith.constant 2 : index
    %c0_22 = arith.constant 0 : index
    %c0_23 = arith.constant 0 : index
    %30 = vector.load %arg3[%c2_21, %c0_22, %c0_23] : memref<5x64x64xbf16, #tpu.memory_space<vmem>>, vector<1x64x64xbf16>
    %31 = vector.shape_cast %30 : vector<1x64x64xbf16> to vector<64x64xbf16>
    %32 = arith.truncf %29 : vector<64x128xf32> to vector<64x128xbf16>
    %cst_24 = arith.constant dense<0.000000e+00> : vector<64x128xf32>
    %33 = tpu.matmul %31, %32, %cst_24 {dimension_numbers = #tpu.dot_dimension_numbers<[1], [0], [0], [1], [0, 0, 1, 1], [], []>} : vector<64x64xbf16>, vector<64x128xbf16>, vector<64x128xf32> -> vector<64x128xf32>
    %c3 = arith.constant 3 : index
    %c0_25 = arith.constant 0 : index
    %c0_26 = arith.constant 0 : index
    %34 = vector.load %arg4[%c3, %c0_25, %c0_26] : memref<6x64x1xf32, #tpu.memory_space<vmem>>, vector<1x64x1xf32>
    %35 = vector.shape_cast %34 : vector<1x64x1xf32> to vector<64x1xf32>
    %36 = vector.broadcast %35 : vector<64x1xf32> to vector<64x128xf32>
    %37 = arith.addf %33, %36 : vector<64x128xf32>
    %cst_27 = arith.constant 0.000000e+00 : f32
    %38 = vector.broadcast %cst_27 : f32 to vector<64x128xf32>
    %39 = arith.maximumf %37, %38 : vector<64x128xf32>
    %c3_28 = arith.constant 3 : index
    %c0_29 = arith.constant 0 : index
    %c0_30 = arith.constant 0 : index
    %40 = vector.load %arg3[%c3_28, %c0_29, %c0_30] : memref<5x64x64xbf16, #tpu.memory_space<vmem>>, vector<1x64x64xbf16>
    %41 = vector.shape_cast %40 : vector<1x64x64xbf16> to vector<64x64xbf16>
    %42 = arith.truncf %39 : vector<64x128xf32> to vector<64x128xbf16>
    %cst_31 = arith.constant dense<0.000000e+00> : vector<64x128xf32>
    %43 = tpu.matmul %41, %42, %cst_31 {dimension_numbers = #tpu.dot_dimension_numbers<[1], [0], [0], [1], [0, 0, 1, 1], [], []>} : vector<64x64xbf16>, vector<64x128xbf16>, vector<64x128xf32> -> vector<64x128xf32>
    %c4 = arith.constant 4 : index
    %c0_32 = arith.constant 0 : index
    %c0_33 = arith.constant 0 : index
    %44 = vector.load %arg4[%c4, %c0_32, %c0_33] : memref<6x64x1xf32, #tpu.memory_space<vmem>>, vector<1x64x1xf32>
    %45 = vector.shape_cast %44 : vector<1x64x1xf32> to vector<64x1xf32>
    %46 = vector.broadcast %45 : vector<64x1xf32> to vector<64x128xf32>
    %47 = arith.addf %43, %46 : vector<64x128xf32>
    %cst_34 = arith.constant 0.000000e+00 : f32
    %48 = vector.broadcast %cst_34 : f32 to vector<64x128xf32>
    %49 = arith.maximumf %47, %48 : vector<64x128xf32>
    %c4_35 = arith.constant 4 : index
    %c0_36 = arith.constant 0 : index
    %c0_37 = arith.constant 0 : index
    %50 = vector.load %arg3[%c4_35, %c0_36, %c0_37] : memref<5x64x64xbf16, #tpu.memory_space<vmem>>, vector<1x64x64xbf16>
    %51 = vector.shape_cast %50 : vector<1x64x64xbf16> to vector<64x64xbf16>
    %52 = arith.truncf %49 : vector<64x128xf32> to vector<64x128xbf16>
    %cst_38 = arith.constant dense<0.000000e+00> : vector<64x128xf32>
    %53 = tpu.matmul %51, %52, %cst_38 {dimension_numbers = #tpu.dot_dimension_numbers<[1], [0], [0], [1], [0, 0, 1, 1], [], []>} : vector<64x64xbf16>, vector<64x128xbf16>, vector<64x128xf32> -> vector<64x128xf32>
    %c5 = arith.constant 5 : index
    %c0_39 = arith.constant 0 : index
    %c0_40 = arith.constant 0 : index
    %54 = vector.load %arg4[%c5, %c0_39, %c0_40] : memref<6x64x1xf32, #tpu.memory_space<vmem>>, vector<1x64x1xf32>
    %55 = vector.shape_cast %54 : vector<1x64x1xf32> to vector<64x1xf32>
    %56 = vector.broadcast %55 : vector<64x1xf32> to vector<64x128xf32>
    %57 = arith.addf %53, %56 : vector<64x128xf32>
    %cst_41 = arith.constant 0.000000e+00 : f32
    %58 = vector.broadcast %cst_41 : f32 to vector<64x128xf32>
    %59 = arith.maximumf %57, %58 : vector<64x128xf32>
    %c0_42 = arith.constant 0 : index
    %c0_43 = arith.constant 0 : index
    %60 = vector.load %arg5[%c0_42, %c0_43] : memref<64x1xf32, #tpu.memory_space<vmem>>, vector<64x1xf32>
    %61 = vector.broadcast %60 : vector<64x1xf32> to vector<64x128xf32>
    %62 = arith.mulf %59, %61 : vector<64x128xf32>
    %cst_44 = arith.constant dense<0.000000e+00> : vector<128xf32>
    %63 = vector.multi_reduction <add>, %62, %cst_44 [0] : vector<64x128xf32> to vector<128xf32>
    %64 = vector.shape_cast %63 : vector<128xf32> to vector<1x128xf32>
    %c0_45 = arith.constant 0 : index
    %c0_46 = arith.constant 0 : index
    %65 = vector.load %arg6[%c0_45, %c0_46] : memref<1x1xf32, #tpu.memory_space<vmem>>, vector<1x1xf32>
    %66 = vector.broadcast %65 : vector<1x1xf32> to vector<1x128xf32>
    %67 = arith.addf %64, %66 : vector<1x128xf32>
    %c0_47 = arith.constant 0 : index
    %c0_48 = arith.constant 0 : index
    %68 = vector.load %arg7[%c0_47, %c0_48] : memref<1x128xf32, #tpu.memory_space<vmem>>, vector<1x128xf32>
    tpu.vector_store %arg7[%c0_47, %c0_48], %67 {strides = array<i32>} : memref<1x128xf32, #tpu.memory_space<vmem>>, vector<1x128xf32>,
    return
  }
  func.func @transform_0(%arg0: i32) -> (i32, i32) {
    %c0_i32 = arith.constant 0 : i32
    %c0_i32_0 = arith.constant 0 : i32
    return %c0_i32, %arg0 : i32, i32
  }
  func.func @transform_1(%arg0: i32) -> (i32, i32) {
    %c0_i32 = arith.constant 0 : i32
    %c0_i32_0 = arith.constant 0 : i32
    %c0_i32_1 = arith.constant 0 : i32
    return %c0_i32, %c0_i32_0 : i32, i32
  }
  func.func @transform_2(%arg0: i32) -> (i32, i32, i32) {
    %c0_i32 = arith.constant 0 : i32
    %c0_i32_0 = arith.constant 0 : i32
    %c0_i32_1 = arith.constant 0 : i32
    %c0_i32_2 = arith.constant 0 : i32
    return %c0_i32, %c0_i32_0, %c0_i32_1 : i32, i32, i32
  }
  func.func @transform_3(%arg0: i32) -> (i32, i32, i32) {
    %c0_i32 = arith.constant 0 : i32
    %c0_i32_0 = arith.constant 0 : i32
    %c0_i32_1 = arith.constant 0 : i32
    %c0_i32_2 = arith.constant 0 : i32
    return %c0_i32, %c0_i32_0, %c0_i32_1 : i32, i32, i32
  }
  func.func @transform_4(%arg0: i32) -> (i32, i32) {
    %c0_i32 = arith.constant 0 : i32
    %c0_i32_0 = arith.constant 0 : i32
    %c0_i32_1 = arith.constant 0 : i32
    return %c0_i32, %c0_i32_0 : i32, i32
  }
  func.func @transform_5(%arg0: i32) -> (i32, i32) {
    %c0_i32 = arith.constant 0 : i32
    %c0_i32_0 = arith.constant 0 : i32
    %c0_i32_1 = arith.constant 0 : i32
    return %c0_i32, %c0_i32_0 : i32, i32
  }
  func.func @transform_6(%arg0: i32) -> (i32, i32) {
    %c0_i32 = arith.constant 0 : i32
    %c0_i32_0 = arith.constant 0 : i32
    return %c0_i32, %arg0 : i32, i32
  }
}

</mosaic_0001>

<bundles_post_ra>
// kernel: tpu_custom_call.1
= control target key start
LH: loop header
LB: loop body
LE: loop exit
PB: predicated region body
PF: predicated region fallthrough
CT: control target
= control target key end

     0   :  { %s1470_s0 = inlined_call_operand.vmem [shape: f32[8,128], index: 0, kind: input, shape index: {}]   ;;  %s1471_s1 = inlined_call_operand.vmem [shape: bf16[64,8], index: 1, kind: input, shape index: {}]   ;;  %s1472_s2 = inlined_call_operand.vmem [shape: bf16[5,64,64], index: 2, kind: input, shape index: {}]   ;;  %s1473_s3 = inlined_call_operand.vmem [shape: f32[6,64,1], index: 3, kind: input, shape index: {}]   ;;  %s1474_s4 = inlined_call_operand.vmem [shape: f32[64,1], index: 4, kind: input, shape index: {}]   ;;  %s1475_s5 = inlined_call_operand.<no memory space> [shape: f32[1,1], index: 5, kind: input, shape index: {}]   ;;  %s1476_s6 = inlined_call_operand.hbm [shape: f32[1,128], index: 6, kind: output, shape index: {}]  }
   0x1   :  { %v11_v0 = vstv %s1475_s5 }
   0x2   :  { %12 = vst [vmem:[#allocation2] sm:$0x1] %v11_v0 }
   0x3   :  { %v43_v1 = vld [vmem:[%s1473_s3 + $0x30] sm:$0xff]  ;;  %v41_v2 = vld [vmem:[%s1473_s3 + $0x20] sm:$0xff]  ;;  %v1160_v4 = vmov 0   ;;  %vm118_vm0 = vcmask 1043456   ;;  %v1101_v8 = vld [vmem:[%s1471_s1 + $0x8] sm:$0xff]  ;;  %vm105_vm1 = vcmask 64512  }
   0x4   :  { %v39_v3 = vld [vmem:[%s1473_s3 + $0x10] sm:$0xff]  ;;  %1133 = vset.pattern.permute.xlu2 %v1160_v4  ;;  %1132 = vset.pattern.permute.xlu1 %v1160_v4  ;;  %v35_v5 = vld [vmem:[%s1470_s0] sm:$0xff] }
   0x5   :  { %1131 = vset.pattern.permute.xlu0 %v1160_v4  ;;  %67 = vperm.xlu1 %1132, %v41_v2   ;;  %v36_v6 = vpack.c.bf16 %v35_v5, %v35_v5  ;;  %v1100_v9 = vld [vmem:[%s1471_s1] sm:$0xff] }
   0x6   :  { %77 = vperm.xlu0 %1131, %v43_v1   ;;  %57 = vperm.xlu2 %1133, %v39_v3  }
   0x7   :  { %v120_v7 = vsel %vm118_vm0, %v36_v6, 0 }
   0x8   :  { %1124 = vmatpush.bf16.msra.mxu3 %v120_v7  ;;  %129 = vmatpush.bf16.msra.mxu0 %v120_v7 }
   0x9   :  { %13 = vsyncpa [#allocation4], 0  ;;  %v42_v10 = vld [vmem:[%s1473_s3 + $0x28] sm:$0xff]  ;;  %v44_v11 = vld [vmem:[%s1473_s3 + $0x38] sm:$0xff]  ;;  %vm240_vm2 = vcmask 523264   ;;  %s899_s23 = sshll.u32 %s1476_s6, 4  ;;  %s900_s23 = int_to_ptr.hbm [resolvable:$true] %s899_s23 }
   0xa   :  { %v40_v12 = vld [vmem:[%s1473_s3 + $0x18] sm:$0xff]  ;;  %v38_v13 = vld [vmem:[%s1473_s3 + $0x8] sm:$0xff]  ;;  %v934_v14 = vld [vmem:[%s1473_s3 + $0x70] sm:$0xff] }
   0xb   :  { %925 = vmatmul.msk.bf16.vlgmr.msra.gmra.mxu3 %vm105_vm1, %v1101_v8  ;;  %924 = vmatmul.msk.bf16.vlgmr.msra.gmra.mxu0 %vm105_vm1, %v1100_v9  ;;  %v37_v15 = vld [vmem:[%s1473_s3] sm:$0xff]  ;;  %v1102_v16 = vld [vmem:[%s1471_s1 + $0x10] sm:$0xff]  ;;  %v933_v18 = vld [vmem:[%s1473_s3 + $0x68] sm:$0xff] }
   0xc   :  { %v932_v17 = vld [vmem:[%s1473_s3 + $0x60] sm:$0xff]  ;;  %v935_v19 = vld [vmem:[%s1473_s3 + $0x78] sm:$0xff]  ;;  %v930_v22 = vld [vmem:[%s1473_s3 + $0x50] sm:$0xff] }
   0xd   :  { %72 = vperm.xlu1 %1132, %v42_v10   ;;  %v931_v20 = vld [vmem:[%s1473_s3 + $0x58] sm:$0xff]  ;;  %v928_v21 = vld [vmem:[%s1473_s3 + $0x40] sm:$0xff]  ;;  %v970_v24 = vld [vmem:[%s1473_s3 + $0xb0] sm:$0xff] }
   0xe   :  { %82 = vperm.xlu0 %1131, %v44_v11   ;;  %62 = vperm.xlu2 %1133, %v40_v12   ;;  %v1103_v23 = vld [vmem:[%s1471_s1 + $0x18] sm:$0xff]  ;;  %v929_v26 = vld [vmem:[%s1473_s3 + $0x48] sm:$0xff]  ;;  %v966_v28 = vld [vmem:[%s1473_s3 + $0x90] sm:$0xff] }
   0xf   :  { %v971_v25 = vld [vmem:[%s1473_s3 + $0xb8] sm:$0xff]  ;;  %v969_v27 = vld [vmem:[%s1473_s3 + $0xa8] sm:$0xff]  ;;  %v968_v29 = vld [vmem:[%s1473_s3 + $0xa0] sm:$0xff] }
  0x10   :  { %v964_v30 = vld [vmem:[%s1473_s3 + $0x80] sm:$0xff]  ;;  %v965_v31 = vld [vmem:[%s1473_s3 + $0x88] sm:$0xff]  ;;  %v967_v32 = vld [vmem:[%s1473_s3 + $0x98] sm:$0xff] }
  0x11   :  { %v1007_v33 = vld [vmem:[%s1473_s3 + $0xf8] sm:$0xff]  ;;  %v1004_v34 = vld [vmem:[%s1473_s3 + $0xe0] sm:$0xff]  ;;  %v1006_v35 = vld [vmem:[%s1473_s3 + $0xf0] sm:$0xff] }
  0x12   :  { %v1002_v36 = vld [vmem:[%s1473_s3 + $0xd0] sm:$0xff]  ;;  %v1003_v37 = vld [vmem:[%s1473_s3 + $0xd8] sm:$0xff]  ;;  %v1005_v38 = vld [vmem:[%s1473_s3 + $0xe8] sm:$0xff] }
  0x13   :  { %v1001_v39 = vld [vmem:[%s1473_s3 + $0xc8] sm:$0xff]  ;;  %v1042_v40 = vld [vmem:[%s1473_s3 + $0x130] sm:$0xff]  ;;  %v1000_v41 = vld [vmem:[%s1473_s3 + $0xc0] sm:$0xff] }
  0x14   :  { %v1040_v42 = vld [vmem:[%s1473_s3 + $0x120] sm:$0xff]  ;;  %v1041_v43 = vld [vmem:[%s1473_s3 + $0x128] sm:$0xff]  ;;  %v1043_v44 = vld [vmem:[%s1473_s3 + $0x138] sm:$0xff] }
  0x15   :  { %52 = vperm.xlu1 %1132, %v38_v13   ;;  %v1039_v45 = vld [vmem:[%s1473_s3 + $0x118] sm:$0xff]  ;;  %v1036_v46 = vld [vmem:[%s1473_s3 + $0x100] sm:$0xff]  ;;  %v1038_v47 = vld [vmem:[%s1473_s3 + $0x110] sm:$0xff] }
  0x16   :  { %212 = vperm.xlu2 %1133, %v934_v14   ;;  %47 = vperm.xlu0 %1131, %v37_v15   ;;  %v1072_v48 = vld [vmem:[%s1473_s3 + $0x140] sm:$0xff]  ;;  %v1073_v49 = vld [vmem:[%s1473_s3 + $0x148] sm:$0xff]  ;;  %v1075_v51 = vld [vmem:[%s1473_s3 + $0x158] sm:$0xff] }
  0x17   :  { %v1037_v50 = vld [vmem:[%s1473_s3 + $0x108] sm:$0xff]  ;;  %v1076_v52 = vld [vmem:[%s1473_s3 + $0x160] sm:$0xff]  ;;  %v1074_v53 = vld [vmem:[%s1473_s3 + $0x150] sm:$0xff] }
  0x18   :  { %v814_v54 = vld [vmem:[%s1474_s4] sm:$0xff]  ;;  %v815_v55 = vld [vmem:[%s1474_s4 + $0x8] sm:$0xff]  ;;  %v817_v57 = vld [vmem:[%s1474_s4 + $0x18] sm:$0xff] }
  0x19   :  { %v1077_v56 = vld [vmem:[%s1473_s3 + $0x168] sm:$0xff]  ;;  %v1078_v58 = vld [vmem:[%s1473_s3 + $0x170] sm:$0xff]  ;;  %v1079_v60 = vld [vmem:[%s1473_s3 + $0x178] sm:$0xff] }
  0x1a   :  { %v816_v59 = vld [vmem:[%s1474_s4 + $0x10] sm:$0xff]  ;;  %v819_v61 = vld [vmem:[%s1474_s4 + $0x28] sm:$0xff]  ;;  %v818_v62 = vld [vmem:[%s1474_s4 + $0x20] sm:$0xff] }
  0x1b   :  { %926 = vmatmul.msk.bf16.gmra.mxu3 %vm105_vm1, %v1102_v16  ;;  %v821_v0 = vld [vmem:[%s1474_s4 + $0x38] sm:$0xff]  ;;  %v883_v1 = vld [vmem:[#allocation2] sm:$0x1]  ;;  %v820_v2 = vld [vmem:[%s1474_s4 + $0x30] sm:$0xff] }
  0x1d   :  { %202 = vperm.xlu1 %1132, %v932_v17  }
  0x1e   :  { %207 = vperm.xlu2 %1133, %v933_v18   ;;  %217 = vperm.xlu0 %1131, %v935_v19  }
  0x25   :  { %197 = vperm.xlu1 %1132, %v931_v20  }
  0x26   :  { %182 = vperm.xlu2 %1133, %v928_v21   ;;  %192 = vperm.xlu0 %1131, %v930_v22  }
  0x2b   :  { %927 = vmatmul.msk.bf16.gmra.mxu3 %vm105_vm1, %v1103_v23 }
  0x2d   :  { %344 = vperm.xlu1 %1132, %v970_v24  }
  0x2e   :  { %349 = vperm.xlu2 %1133, %v971_v25   ;;  %187 = vperm.xlu0 %1131, %v929_v26  }
  0x35   :  { %339 = vperm.xlu1 %1132, %v969_v27  }
  0x36   :  { %324 = vperm.xlu2 %1133, %v966_v28   ;;  %334 = vperm.xlu0 %1131, %v968_v29  }
  0x3d   :  { %314 = vperm.xlu1 %1132, %v964_v30  }
  0x3e   :  { %319 = vperm.xlu2 %1133, %v965_v31   ;;  %329 = vperm.xlu0 %1131, %v967_v32  }
  0x45   :  { %480 = vperm.xlu1 %1132, %v1007_v33  }
  0x46   :  { %465 = vperm.xlu2 %1133, %v1004_v34   ;;  %475 = vperm.xlu0 %1131, %v1006_v35  }
  0x4d   :  { %455 = vperm.xlu1 %1132, %v1002_v36  }
  0x4e   :  { %460 = vperm.xlu2 %1133, %v1003_v37   ;;  %470 = vperm.xlu0 %1131, %v1005_v38   ;;  %v1104_v38 = vld [vmem:[%s1472_s2] sm:$0xff] }
  0x55   :  { %450 = vperm.xlu1 %1132, %v1001_v39   ;;  %v1106_v39 = vld [vmem:[%s1472_s2 + $0x10] sm:$0xff] }
  0x56   :  { %606 = vperm.xlu2 %1133, %v1042_v40   ;;  %445 = vperm.xlu0 %1131, %v1000_v41   ;;  %v1105_v40 = vld [vmem:[%s1472_s2 + $0x8] sm:$0xff]  ;;  %v1107_v41 = vld [vmem:[%s1472_s2 + $0x18] sm:$0xff] }
  0x5d   :  { %596 = vperm.xlu1 %1132, %v1040_v42  }
  0x5e   :  { %601 = vperm.xlu2 %1133, %v1041_v43   ;;  %611 = vperm.xlu0 %1131, %v1043_v44  }
  0x60   :  { %v58_v9 = vpop.permute.xlu2 %57 }
  0x65   :  { %591 = vperm.xlu1 %1132, %v1039_v45  }
  0x66   :  { %576 = vperm.xlu2 %1133, %v1036_v46   ;;  %586 = vperm.xlu0 %1131, %v1038_v47  }
  0x68   :  { %v63_v20 = vpop.permute.xlu2 %62 }
  0x6d   :  { %707 = vperm.xlu1 %1132, %v1072_v48  }
  0x6e   :  { %712 = vperm.xlu2 %1133, %v1073_v49   ;;  %581 = vperm.xlu0 %1131, %v1037_v50  }
  0x70   :  { %v213_v47 = vpop.permute.xlu2 %212 }
  0x75   :  { %722 = vperm.xlu1 %1132, %v1075_v51  }
  0x76   :  { %727 = vperm.xlu2 %1133, %v1076_v52   ;;  %717 = vperm.xlu0 %1131, %v1074_v53  }
  0x77   :  { %v68_v7 = vpop.permute.xlu1 %67 }
  0x78   :  { %v78_v6 = vpop.permute.xlu0 %77  ;;  %v208_v53 = vpop.permute.xlu2 %207 }
  0x7d   :  { %824 = vperm.xlu1 %1132, %v814_v54  }
  0x7e   :  { %829 = vperm.xlu2 %1133, %v815_v55   ;;  %732 = vperm.xlu0 %1131, %v1077_v56  }
  0x7f   :  { %v73_v12 = vpop.permute.xlu1 %72 }
  0x80   :  { %v83_v11 = vpop.permute.xlu0 %82 }
  0x85   :  { %839 = vperm.xlu1 %1132, %v817_v57  }
  0x86   :  { %737 = vperm.xlu2 %1133, %v1078_v58   ;;  %834 = vperm.xlu0 %1131, %v816_v59  }
  0x87   :  { %v53_v27 = vpop.permute.xlu1 %52 }
  0x88   :  { %v131_v10 = vpop.f32.mrf.mxu0  ;;  %v48_v28 = vpop.permute.xlu0 %47 }
  0x89   :  { %v132_v30 = vadd.f32 %v131_v10, %v48_v28 }
  0x8b   :  { %v151_v34 = vmax.f32 %v132_v30, 0.0 }
  0x8d   :  { %742 = vperm.xlu1 %1132, %v1079_v60  }
  0x8e   :  { %849 = vperm.xlu2 %1133, %v819_v61   ;;  %844 = vperm.xlu0 %1131, %v818_v62   ;;  %v136_v63 = vpop.f32.mrf.mxu3 }
  0x8f   :  { %v137_v25 = vadd.f32 %v136_v63, %v58_v9  ;;  %v203_v50 = vpop.permute.xlu1 %202 }
  0x90   :  { %v133_v24 = vpop.f32.mrf.mxu0  ;;  %v218_v46 = vpop.permute.xlu0 %217 }
  0x91   :  { %v134_v31 = vadd.f32 %v133_v24, %v53_v27  ;;  %v153_v33 = vmax.f32 %v137_v25, 0.0 }
  0x93   :  { %v152_v35 = vmax.f32 %v134_v31, 0.0 }
  0x95   :  { %859 = vperm.xlu1 %1132, %v821_v0   ;;  %v167_v37 = vpack.c.bf16 %v152_v35, %v151_v34 }
  0x96   :  { %886 = vperm.xlu2 %1133, %v883_v1   ;;  %854 = vperm.xlu0 %1131, %v820_v2   ;;  %v138_v3 = vpop.f32.mrf.mxu3 }
  0x97   :  { %v139_v21 = vadd.f32 %v138_v3, %v63_v20  ;;  %v198_v61 = vpop.permute.xlu1 %197 }
  0x98   :  { %v193_v51 = vpop.permute.xlu0 %192 }
  0x99   :  { %v154_v29 = vmax.f32 %v139_v21, 0.0 }
  0x9b   :  { %v168_v36 = vpack.c.bf16 %v154_v29, %v153_v33 }
  0x9e   :  { %v141_v4 = vpop.f32.mrf.mxu3 }
  0x9f   :  { %v142_v17 = vadd.f32 %v141_v4, %v68_v7  ;;  %v183_v7 = vpop.permute.xlu2 %182  ;;  %v345_v25 = vpop.permute.xlu1 %344 }
  0xa0   :  { %v188_v3 = vpop.permute.xlu0 %187 }
  0xa1   :  { %v155_v26 = vmax.f32 %v142_v17, 0.0  ;;  %v1111_v17 = vld [vmem:[%s1472_s2 + $0x38] sm:$0xff] }
  0xa6   :  { %v143_v5 = vpop.f32.mrf.mxu3 }
  0xa7   :  { %v144_v15 = vadd.f32 %v143_v5, %v73_v12  ;;  %v350_v24 = vpop.permute.xlu2 %349  ;;  %v340_v30 = vpop.permute.xlu1 %339 }
  0xa8   :  { %v335_v27 = vpop.permute.xlu0 %334 }
  0xa9   :  { %v156_v22 = vmax.f32 %v144_v15, 0.0  ;;  %v1109_v15 = vld [vmem:[%s1472_s2 + $0x28] sm:$0xff] }
  0xab   :  { %v169_v32 = vpack.c.bf16 %v156_v22, %v155_v26 }
  0xae   :  { %v146_v8 = vpop.f32.mrf.mxu3 }
  0xaf   :  { %v147_v13 = vadd.f32 %v146_v8, %v78_v6  ;;  %v325_v28 = vpop.permute.xlu2 %324 }
  0xb1   :  { %v157_v18 = vmax.f32 %v147_v13, 0.0 }
  0xb6   :  { %v148_v14 = vpop.f32.mrf.mxu3 }
  0xb7   :  { %v149_v16 = vadd.f32 %v148_v14, %v83_v11  ;;  %v1108_v14 = vld [vmem:[%s1472_s2 + $0x20] sm:$0xff] }
  0xb9   :  { %v158_v19 = vmax.f32 %v149_v16, 0.0  ;;  %v1110_v16 = vld [vmem:[%s1472_s2 + $0x30] sm:$0xff] }
  0xbb   :  { %v170_v23 = vpack.c.bf16 %v158_v19, %v157_v18 }
  0xbd   :  { %257 = vmatpush.bf16.msra.mxu1 %v170_v23  ;;  %1125 = vmatpush.bf16.msra.mxu2 %v170_v23 }
  0xc1   :  { %258 = vmatpush.bf16.msra.mxu1 %v169_v32  ;;  %1126 = vmatpush.bf16.msra.mxu2 %v169_v32 }
  0xc5   :  { %259 = vmatpush.bf16.msra.mxu1 %v168_v36  ;;  %1127 = vmatpush.bf16.msra.mxu2 %v168_v36 }
  0xc9   :  { %260 = vmatpush.bf16.msra.mxu1 %v167_v37  ;;  %1128 = vmatpush.bf16.msra.mxu2 %v167_v37  ;;  %v330_v37 = vpop.permute.xlu0 %329 }
  0xcc   :  { %952 = vmatmul.msk.bf16.vlgmr.msra.gmra.mxu1 %vm240_vm2, %v1104_v38  ;;  %954 = vmatmul.msk.bf16.vlgmr.msra.gmra.mxu2 %vm240_vm2, %v1106_v39 }
  0xdc   :  { %953 = vmatmul.msk.bf16.gmra.mxu1 %vm240_vm2, %v1105_v40  ;;  %955 = vmatmul.msk.bf16.gmra.mxu2 %vm240_vm2, %v1107_v41 }
 0x149   :  { %v262_v42 = vpop.f32.mrf.mxu1 }
 0x14a   :  { %v263_v8 = vadd.f32 %v262_v42, %v183_v7 }
 0x14c   :  { %v282_v12 = vmax.f32 %v263_v8, 0.0 }
 0x14f   :  { %v272_v43 = vpop.f32.mrf.mxu2 }
 0x150   :  { %v273_v58 = vadd.f32 %v272_v43, %v203_v50  ;;  %v320_v43 = vpop.permute.xlu2 %319 }
 0x151   :  { %v264_v44 = vpop.f32.mrf.mxu1 }
 0x152   :  { %v286_v1 = vmax.f32 %v273_v58, 0.0  ;;  %v265_v4 = vadd.f32 %v264_v44, %v188_v3 }
 0x154   :  { %v283_v10 = vmax.f32 %v265_v4, 0.0 }
 0x156   :  { %v299_v13 = vpack.c.bf16 %v283_v10, %v282_v12 }
 0x157   :  { %v274_v45 = vpop.f32.mrf.mxu2 }
 0x158   :  { %v275_v55 = vadd.f32 %v274_v45, %v208_v53  ;;  %v466_v3 = vpop.permute.xlu2 %465 }
 0x159   :  { %v267_v48 = vpop.f32.mrf.mxu1 }
 0x15a   :  { %v287_v62 = vmax.f32 %v275_v55, 0.0  ;;  %v268_v2 = vadd.f32 %v267_v48, %v193_v51  ;;  %v1113_v55 = vld [vmem:[%s1472_s2 + $0x48] sm:$0xff] }
 0x15c   :  { %v301_v6 = vpack.c.bf16 %v287_v62, %v286_v1  ;;  %v284_v9 = vmax.f32 %v268_v2, 0.0  ;;  %v476_v1 = vpop.permute.xlu0 %475 }
 0x15f   :  { %v277_v49 = vpop.f32.mrf.mxu2 }
 0x160   :  { %v278_v52 = vadd.f32 %v277_v49, %v213_v47  ;;  %v315_v47 = vpop.permute.xlu1 %314 }
 0x161   :  { %v269_v57 = vpop.f32.mrf.mxu1 }
 0x162   :  { %v288_v59 = vmax.f32 %v278_v52, 0.0  ;;  %v270_v63 = vadd.f32 %v269_v57, %v198_v61  ;;  %v1115_v57 = vld [vmem:[%s1472_s2 + $0x58] sm:$0xff] }
 0x164   :  { %v285_v5 = vmax.f32 %v270_v63, 0.0 }
 0x166   :  { %v300_v11 = vpack.c.bf16 %v285_v5, %v284_v9 }
 0x167   :  { %v279_v54 = vpop.f32.mrf.mxu2 }
 0x168   :  { %v280_v56 = vadd.f32 %v279_v54, %v218_v46  ;;  %v1112_v54 = vld [vmem:[%s1472_s2 + $0x40] sm:$0xff] }
 0x16a   :  { %v289_v60 = vmax.f32 %v280_v56, 0.0  ;;  %v1114_v56 = vld [vmem:[%s1472_s2 + $0x50] sm:$0xff] }
 0x16c   :  { %v302_v0 = vpack.c.bf16 %v289_v60, %v288_v59 }
 0x16e   :  { %388 = vmatpush.bf16.msrb.mxu2 %v302_v0  ;;  %v481_v0 = vpop.permute.xlu1 %480 }
 0x172   :  { %389 = vmatpush.bf16.msrb.mxu2 %v301_v6  ;;  %v471_v6 = vpop.permute.xlu0 %470 }
 0x176   :  { %390 = vmatpush.bf16.msrb.mxu2 %v300_v11  ;;  %v456_v4 = vpop.permute.xlu1 %455 }
 0x17a   :  { %391 = vmatpush.bf16.msrb.mxu2 %v299_v13  ;;  %v461_v13 = vpop.permute.xlu2 %460 }
 0x17d   :  { %988 = vmatmul.msk.bf16.vlgmr.msrb.gmra.mxu2 %vm240_vm2, %v1108_v14 }
 0x18d   :  { %989 = vmatmul.msk.bf16.gmra.mxu2 %vm240_vm2, %v1109_v15 }
 0x19d   :  { %990 = vmatmul.msk.bf16.gmra.mxu2 %vm240_vm2, %v1110_v16 }
 0x1ad   :  { %991 = vmatmul.msk.bf16.gmra.mxu2 %vm240_vm2, %v1111_v17 }
 0x200   :  { %v393_v18 = vpop.f32.mrf.mxu2 }
 0x201   :  { %v394_v48 = vadd.f32 %v393_v18, %v315_v47 }
 0x203   :  { %v413_v52 = vmax.f32 %v394_v48, 0.0 }
 0x208   :  { %v395_v19 = vpop.f32.mrf.mxu2 }
 0x209   :  { %v396_v44 = vadd.f32 %v395_v19, %v320_v43  ;;  %v451_v19 = vpop.permute.xlu1 %450 }
 0x20b   :  { %v414_v50 = vmax.f32 %v396_v44, 0.0 }
 0x20d   :  { %v430_v53 = vpack.c.bf16 %v414_v50, %v413_v52 }
 0x210   :  { %v398_v20 = vpop.f32.mrf.mxu2 }
 0x211   :  { %v399_v41 = vadd.f32 %v398_v20, %v325_v28  ;;  %v597_v43 = vpop.permute.xlu1 %596 }
 0x213   :  { %v415_v49 = vmax.f32 %v399_v41, 0.0  ;;  %v607_v41 = vpop.permute.xlu2 %606 }
 0x218   :  { %v400_v21 = vpop.f32.mrf.mxu2 }
 0x219   :  { %v401_v38 = vadd.f32 %v400_v21, %v330_v37 }
 0x21b   :  { %v416_v45 = vmax.f32 %v401_v38, 0.0 }
 0x21d   :  { %v431_v51 = vpack.c.bf16 %v416_v45, %v415_v49 }
 0x220   :  { %v403_v22 = vpop.f32.mrf.mxu2 }
 0x221   :  { %v404_v34 = vadd.f32 %v403_v22, %v335_v27 }
 0x223   :  { %v417_v42 = vmax.f32 %v404_v34, 0.0 }
 0x228   :  { %v405_v23 = vpop.f32.mrf.mxu2 }
 0x229   :  { %v406_v32 = vadd.f32 %v405_v23, %v340_v30  ;;  %v446_v23 = vpop.permute.xlu0 %445  ;;  %v1116_v30 = vld [vmem:[%s1472_s2 + $0x60] sm:$0xff] }
 0x22b   :  { %v418_v39 = vmax.f32 %v406_v32, 0.0  ;;  %v1118_v32 = vld [vmem:[%s1472_s2 + $0x70] sm:$0xff] }
 0x22d   :  { %v432_v46 = vpack.c.bf16 %v418_v39, %v417_v42 }
 0x230   :  { %v408_v26 = vpop.f32.mrf.mxu2 }
 0x231   :  { %v409_v29 = vadd.f32 %v408_v26, %v345_v25 }
 0x233   :  { %v419_v35 = vmax.f32 %v409_v29, 0.0 }
 0x238   :  { %v410_v31 = vpop.f32.mrf.mxu2 }
 0x239   :  { %v411_v33 = vadd.f32 %v410_v31, %v350_v24  ;;  %v1117_v31 = vld [vmem:[%s1472_s2 + $0x68] sm:$0xff] }
 0x23b   :  { %v420_v36 = vmax.f32 %v411_v33, 0.0  ;;  %v1119_v33 = vld [vmem:[%s1472_s2 + $0x78] sm:$0xff] }
 0x23d   :  { %v433_v40 = vpack.c.bf16 %v420_v36, %v419_v35 }
 0x23f   :  { %519 = vmatpush.bf16.msrb.mxu3 %v433_v40  ;;  %v612_v40 = vpop.permute.xlu0 %611 }
 0x243   :  { %520 = vmatpush.bf16.msrb.mxu3 %v432_v46  ;;  %v602_v46 = vpop.permute.xlu2 %601 }
 0x247   :  { %521 = vmatpush.bf16.msrb.mxu3 %v431_v51  ;;  %v587_v44 = vpop.permute.xlu0 %586 }
 0x24b   :  { %522 = vmatpush.bf16.msrb.mxu3 %v430_v53  ;;  %v592_v53 = vpop.permute.xlu1 %591 }
 0x24e   :  { %1024 = vmatmul.msk.bf16.vlgmr.msrb.gmra.mxu3 %vm240_vm2, %v1112_v54 }
 0x25e   :  { %1025 = vmatmul.msk.bf16.gmra.mxu3 %vm240_vm2, %v1113_v55 }
 0x26e   :  { %1026 = vmatmul.msk.bf16.gmra.mxu3 %vm240_vm2, %v1114_v56 }
 0x27e   :  { %1027 = vmatmul.msk.bf16.gmra.mxu3 %vm240_vm2, %v1115_v57 }
 0x2d1   :  { %v524_v58 = vpop.f32.mrf.mxu3 }
 0x2d2   :  { %v525_v24 = vadd.f32 %v524_v58, %v446_v23 }
 0x2d4   :  { %v544_v28 = vmax.f32 %v525_v24, 0.0 }
 0x2d9   :  { %v526_v59 = vpop.f32.mrf.mxu3 }
 0x2da   :  { %v527_v20 = vadd.f32 %v526_v59, %v451_v19  ;;  %v582_v59 = vpop.permute.xlu0 %581 }
 0x2dc   :  { %v545_v26 = vmax.f32 %v527_v20, 0.0 }
 0x2de   :  { %v561_v29 = vpack.c.bf16 %v545_v26, %v544_v28 }
 0x2e1   :  { %v529_v60 = vpop.f32.mrf.mxu3 }
 0x2e2   :  { %v530_v17 = vadd.f32 %v529_v60, %v456_v4 }
 0x2e4   :  { %v546_v25 = vmax.f32 %v530_v17, 0.0 }
 0x2e9   :  { %v531_v61 = vpop.f32.mrf.mxu3 }
 0x2ea   :  { %v532_v14 = vadd.f32 %v531_v61, %v461_v13 }
 0x2ec   :  { %v547_v21 = vmax.f32 %v532_v14, 0.0  ;;  %v718_v14 = vpop.permute.xlu0 %717 }
 0x2ee   :  { %v562_v27 = vpack.c.bf16 %v547_v21, %v546_v25 }
 0x2f1   :  { %v534_v62 = vpop.f32.mrf.mxu3 }
 0x2f2   :  { %v535_v10 = vadd.f32 %v534_v62, %v466_v3 }
 0x2f4   :  { %v548_v18 = vmax.f32 %v535_v10, 0.0  ;;  %v733_v19 = vpop.permute.xlu0 %732 }
 0x2f9   :  { %v536_v63 = vpop.f32.mrf.mxu3 }
 0x2fa   :  { %v537_v8 = vadd.f32 %v536_v63, %v471_v6  ;;  %v577_v63 = vpop.permute.xlu2 %576  ;;  %v1120_v6 = vld [vmem:[%s1472_s2 + $0x80] sm:$0xff] }
 0x2fc   :  { %v549_v15 = vmax.f32 %v537_v8, 0.0  ;;  %v1122_v8 = vld [vmem:[%s1472_s2 + $0x90] sm:$0xff]  ;;  %v835_v23 = vpop.permute.xlu0 %834 }
 0x2fe   :  { %v563_v22 = vpack.c.bf16 %v549_v15, %v548_v18 }
 0x301   :  { %v539_v2 = vpop.f32.mrf.mxu3 }
 0x302   :  { %v540_v5 = vadd.f32 %v539_v2, %v476_v1  ;;  %v713_v13 = vpop.permute.xlu2 %712 }
 0x304   :  { %v550_v11 = vmax.f32 %v540_v5, 0.0 }
 0x309   :  { %v541_v7 = vpop.f32.mrf.mxu3 }
 0x30a   :  { %v542_v9 = vadd.f32 %v541_v7, %v481_v0  ;;  %v1121_v7 = vld [vmem:[%s1472_s2 + $0x88] sm:$0xff]  ;;  %v728_v17 = vpop.permute.xlu2 %727 }
 0x30c   :  { %v551_v12 = vmax.f32 %v542_v9, 0.0  ;;  %v1123_v9 = vld [vmem:[%s1472_s2 + $0x98] sm:$0xff]  ;;  %s1161_s2 = smov [#allocation3]  }
 0x30d   :  { %s897_s20 = sshll.u32 %s1161_s2, 4  ;;  %s898_s20 = int_to_ptr.vmem [resolvable:$true] %s897_s20 }
 0x30e   :  { %v564_v16 = vpack.c.bf16 %v551_v12, %v550_v11  ;;  %v708_v12 = vpop.permute.xlu1 %707 }
 0x310   :  { %650 = vmatpush.bf16.msrb.mxu0 %v564_v16 }
 0x314   :  { %651 = vmatpush.bf16.msrb.mxu0 %v563_v22  ;;  %v830_v22 = vpop.permute.xlu2 %829 }
 0x316   :  { %v723_v16 = vpop.permute.xlu1 %722 }
 0x318   :  { %652 = vmatpush.bf16.msrb.mxu0 %v562_v27 }
 0x31c   :  { %653 = vmatpush.bf16.msrb.mxu0 %v561_v29 }
 0x31e   :  { %v825_v20 = vpop.permute.xlu1 %824 }
 0x31f   :  { %1060 = vmatmul.msk.bf16.vlgmr.msrb.gmra.mxu0 %vm240_vm2, %v1116_v30 }
 0x326   :  { %v840_v25 = vpop.permute.xlu1 %839 }
 0x32f   :  { %1061 = vmatmul.msk.bf16.gmra.mxu0 %vm240_vm2, %v1117_v31  ;;  %v738_v31 = vpop.permute.xlu2 %737 }
 0x33f   :  { %1062 = vmatmul.msk.bf16.gmra.mxu0 %vm240_vm2, %v1118_v32 }
 0x34f   :  { %1063 = vmatmul.msk.bf16.gmra.mxu0 %vm240_vm2, %v1119_v33 }
 0x39c   :  { %v655_v34 = vpop.f32.mrf.mxu0 }
 0x39d   :  { %v656_v0 = vadd.f32 %v655_v34, %v577_v63 }
 0x39f   :  { %v675_v4 = vmax.f32 %v656_v0, 0.0 }
 0x3a4   :  { %v657_v35 = vpop.f32.mrf.mxu0 }
 0x3a5   :  { %v658_v60 = vadd.f32 %v657_v35, %v582_v59  ;;  %v845_v35 = vpop.permute.xlu0 %844 }
 0x3a7   :  { %v676_v2 = vmax.f32 %v658_v60, 0.0 }
 0x3a9   :  { %v692_v5 = vpack.c.bf16 %v676_v2, %v675_v4 }
 0x3ac   :  { %v660_v36 = vpop.f32.mrf.mxu0 }
 0x3ad   :  { %v661_v57 = vadd.f32 %v660_v36, %v587_v44  ;;  %v743_v44 = vpop.permute.xlu1 %742 }
 0x3af   :  { %v677_v1 = vmax.f32 %v661_v57, 0.0 }
 0x3b4   :  { %v662_v37 = vpop.f32.mrf.mxu0 }
 0x3b5   :  { %v663_v54 = vadd.f32 %v662_v37, %v592_v53 }
 0x3b7   :  { %v678_v61 = vmax.f32 %v663_v54, 0.0  ;;  %v855_v54 = vpop.permute.xlu0 %854 }
 0x3b9   :  { %v693_v3 = vpack.c.bf16 %v678_v61, %v677_v1  ;;  %v860_v61 = vpop.permute.xlu1 %859 }
 0x3bc   :  { %v665_v38 = vpop.f32.mrf.mxu0 }
 0x3bd   :  { %v666_v50 = vadd.f32 %v665_v38, %v597_v43 }
 0x3bf   :  { %v679_v58 = vmax.f32 %v666_v50, 0.0 }
 0x3c4   :  { %v667_v39 = vpop.f32.mrf.mxu0 }
 0x3c5   :  { %v668_v48 = vadd.f32 %v667_v39, %v602_v46 }
 0x3c7   :  { %v680_v55 = vmax.f32 %v668_v48, 0.0 }
 0x3c9   :  { %v694_v62 = vpack.c.bf16 %v680_v55, %v679_v58 }
 0x3cc   :  { %v670_v42 = vpop.f32.mrf.mxu0 }
 0x3cd   :  { %v671_v45 = vadd.f32 %v670_v42, %v607_v41 }
 0x3cf   :  { %v681_v51 = vmax.f32 %v671_v45, 0.0 }
 0x3d4   :  { %v672_v47 = vpop.f32.mrf.mxu0 }
 0x3d5   :  { %v673_v49 = vadd.f32 %v672_v47, %v612_v40 }
 0x3d7   :  { %v682_v52 = vmax.f32 %v673_v49, 0.0 }
 0x3d9   :  { %v695_v56 = vpack.c.bf16 %v682_v52, %v681_v51  ;;  %v850_v51 = vpop.permute.xlu2 %849 }
 0x3db   :  { %781 = vmatpush.bf16.msrb.mxu1 %v695_v56 }
 0x3df   :  { %782 = vmatpush.bf16.msrb.mxu1 %v694_v62 }
 0x3e3   :  { %783 = vmatpush.bf16.msrb.mxu1 %v693_v3 }
 0x3e7   :  { %784 = vmatpush.bf16.msrb.mxu1 %v692_v5  ;;  %v887_v5 = vpop.permute.xlu2 %886 }
 0x3ea   :  { %1096 = vmatmul.msk.bf16.vlgmr.msrb.gmra.mxu1 %vm240_vm2, %v1120_v6 }
 0x3fa   :  { %1097 = vmatmul.msk.bf16.gmra.mxu1 %vm240_vm2, %v1121_v7  ;;  %v889_v7 = vperm.slane %v887_v5, 0 }
 0x40a   :  { %1098 = vmatmul.msk.bf16.gmra.mxu1 %vm240_vm2, %v1122_v8 }
 0x41a   :  { %1099 = vmatmul.msk.bf16.gmra.mxu1 %vm240_vm2, %v1123_v9 }
 0x467   :  { %v786_v10 = vpop.f32.mrf.mxu1 }
 0x468   :  { %v787_v27 = vadd.f32 %v786_v10, %v708_v12 }
 0x46a   :  { %v806_v32 = vmax.f32 %v787_v27, 0.0 }
 0x46c   :  { %v862_v40 = vmul.f32 %v825_v20, %v806_v32 }
 0x46f   :  { %v788_v11 = vpop.f32.mrf.mxu1 }
 0x470   :  { %v789_v24 = vadd.f32 %v788_v11, %v713_v13 }
 0x472   :  { %v807_v29 = vmax.f32 %v789_v24, 0.0 }
 0x474   :  { %v863_v36 = vmul.f32 %v830_v22, %v807_v29 }
 0x476   :  { %v870_v45 = vadd.f32 %v863_v36, %v862_v40 }
 0x477   :  { %v791_v15 = vpop.f32.mrf.mxu1 }
 0x478   :  { %v792_v28 = vadd.f32 %v791_v15, %v718_v14 }
 0x47a   :  { %v808_v33 = vmax.f32 %v792_v28, 0.0 }
 0x47c   :  { %v864_v41 = vmul.f32 %v835_v23, %v808_v33 }
 0x47e   :  { %v871_v48 = vadd.f32 %v870_v45, %v864_v41 }
 0x47f   :  { %v793_v18 = vpop.f32.mrf.mxu1 }
 0x480   :  { %v794_v30 = vadd.f32 %v793_v18, %v723_v16 }
 0x482   :  { %v809_v37 = vmax.f32 %v794_v30, 0.0 }
 0x484   :  { %v865_v46 = vmul.f32 %v840_v25, %v809_v37 }
 0x486   :  { %v872_v52 = vadd.f32 %v871_v48, %v865_v46 }
 0x487   :  { %v796_v21 = vpop.f32.mrf.mxu1 }
 0x488   :  { %v797_v34 = vadd.f32 %v796_v21, %v728_v17 }
 0x48a   :  { %v810_v42 = vmax.f32 %v797_v34, 0.0 }
 0x48c   :  { %v866_v49 = vmul.f32 %v845_v35, %v810_v42 }
 0x48e   :  { %v873_v56 = vadd.f32 %v872_v52, %v866_v49 }
 0x48f   :  { %v798_v26 = vpop.f32.mrf.mxu1 }
 0x490   :  { %v799_v38 = vadd.f32 %v798_v26, %v733_v19 }
 0x492   :  { %v811_v47 = vmax.f32 %v799_v38, 0.0 }
 0x494   :  { %v867_v53 = vmul.f32 %v850_v51, %v811_v47 }
 0x496   :  { %v874_v59 = vadd.f32 %v873_v56, %v867_v53 }
 0x497   :  { %v801_v39 = vpop.f32.mrf.mxu1 }
 0x498   :  { %v802_v43 = vadd.f32 %v801_v39, %v738_v31 }
 0x49a   :  { %v812_v50 = vmax.f32 %v802_v43, 0.0 }
 0x49c   :  { %v868_v57 = vmul.f32 %v855_v54, %v812_v50 }
 0x49e   :  { %v875_v62 = vadd.f32 %v874_v59, %v868_v57 }
 0x49f   :  { %v803_v55 = vpop.f32.mrf.mxu1 }
 0x4a0   :  { %v804_v58 = vadd.f32 %v803_v55, %v743_v44 }
 0x4a2   :  { %v813_v60 = vmax.f32 %v804_v58, 0.0 }
 0x4a4   :  { %v869_v63 = vmul.f32 %v860_v61, %v813_v60 }
 0x4a6   :  { %v876_v0 = vadd.f32 %v875_v62, %v869_v63 }
 0x4a8   :  { %v877_v1 = vrot.slane %v876_v0, 4 }
 0x4aa   :  { %v878_v2 = vadd.f32 %v877_v1, %v876_v0 }
 0x4ac   :  { %v879_v3 = vrot.slane %v878_v2, 2 }
 0x4ae   :  { %v880_v4 = vadd.f32 %v879_v3, %v878_v2 }
 0x4b0   :  { %v881_v6 = vrot.slane %v880_v4, 1 }
 0x4b2   :  { %v882_v8 = vadd.f32 %v881_v6, %v880_v4 }
 0x4b4   :  { %v890_v9 = vadd.f32 %v889_v7, %v882_v8 }
 0x4b6   :  { %891 = vst [vmem:[#allocation3] sm:$0x1] %v890_v9 }
 0x4b7   :  { %902 = dma.vmem_to_hbm [thread:$0]  %s898_s20, 16, %s900_s23, [#allocation4]  }
 0x4b8   :  { %1158 = dma.done.wait [#allocation4], 16  }
 0x4b9   :  { %1159 = vsyncadd [#allocation4], 4294967280 }
 0x4ba   :  { %907 = vsyncpa [#allocation4], 1 }

</bundles_post_ra>
